<compile_context>
chip_gen: v7x
topology: tpu7x:2x2x1
jax: 0.10.0
libtpu: 0.0.40
codegen_flags: <defaults>
</compile_context>

<pallas_src>
import functools
import math

import jax
import jax.numpy as jnp
from jax.experimental import pallas as pl
from jax.experimental.pallas import tpu as pltpu

BN_EPS = 1e-5


# ---------------------------------------------------------------------------
# Pallas kernel 1: fused Linear + BatchNorm1d(seq) + ReLU, batched over the
# two embedding streams (shared + domain) in a single launch.
#   out[d] = relu((A[d] @ W[d] + bias[d]) * row_scale[d] + row_shift[d])
# A/W are fed to the MXU in bf16; accumulation and the epilogue stay in f32.
# ---------------------------------------------------------------------------
def _fused_linear_bn_relu_kernel(a_ref, w_ref, b_ref, scale_ref, shift_ref, o_ref):
    acc = jnp.dot(a_ref[0], w_ref[0], preferred_element_type=jnp.float32)
    out = (acc + b_ref[0]) * scale_ref[0] + shift_ref[0]
    o_ref[0] = jnp.maximum(out, 0.0)


@jax.jit
def fused_linear_bn_relu(a, w, bias, row_scale, row_shift):
    """a: (D, M, K) bf16, w: (D, K, N) bf16, bias: (D, 1, N) f32,
    row_scale/row_shift: (D, M, 1) f32  ->  (D, M, N) f32."""
    D, M, K = a.shape
    N = w.shape[-1]
    return pl.pallas_call(
        _fused_linear_bn_relu_kernel,
        out_shape=jax.ShapeDtypeStruct((D, M, N), jnp.float32),
        grid=(D,),
        in_specs=[
            pl.BlockSpec((1, M, K), lambda d: (d, 0, 0)),
            pl.BlockSpec((1, K, N), lambda d: (d, 0, 0)),
            pl.BlockSpec((1, 1, N), lambda d: (d, 0, 0)),
            pl.BlockSpec((1, M, 1), lambda d: (d, 0, 0)),
            pl.BlockSpec((1, M, 1), lambda d: (d, 0, 0)),
        ],
        out_specs=pl.BlockSpec((1, M, N), lambda d: (d, 0, 0)),
        compiler_params=pltpu.CompilerParams(dimension_semantics=("parallel",)),
    )(a, w, bias, row_scale, row_shift)


# ---------------------------------------------------------------------------
# Pallas kernel 2: final hidden states of packed bidirectional LSTMs.
# Four independent streams run in one kernel invocation:
#   k=0: shared forward, k=1: shared backward, k=2: domain forward, k=3: domain backward.
# Backward streams receive time-reversed inputs; masks gate the state update so
# padded steps never touch (h, c) -> identical to pack_padded_sequence + LSTM h_n.
# ---------------------------------------------------------------------------
def _bilstm_hn_kernel(x_ref, m_ref, wih_ref, whh_ref, b_ref, hn_ref):
    T, KS, Bp, _ = x_ref.shape
    H = whh_ref.shape[1]
    wih = wih_ref[...]            # (KS, E, 4H)
    whh = whh_ref[...]            # (KS, H, 4H)
    b = b_ref[...]                # (KS, 1, 4H)

    def step(t, carry):
        hs, cs = carry
        x_t = x_ref[t]            # (KS, Bp, E)
        m_t = m_ref[t]            # (KS, Bp, 1)
        new_h, new_c = [], []
        for k in range(KS):
            g = (jnp.dot(x_t[k], wih[k], preferred_element_type=jnp.float32)
                 + jnp.dot(hs[k], whh[k], preferred_element_type=jnp.float32)
                 + b[k])
            i_g = jax.nn.sigmoid(g[:, 0 * H:1 * H])
            f_g = jax.nn.sigmoid(g[:, 1 * H:2 * H])
            g_g = jnp.tanh(g[:, 2 * H:3 * H])
            o_g = jax.nn.sigmoid(g[:, 3 * H:4 * H])
            c_n = f_g * cs[k] + i_g * g_g
            h_n = o_g * jnp.tanh(c_n)
            m = m_t[k]            # (Bp, 1)
            new_h.append(m * h_n + (1.0 - m) * hs[k])
            new_c.append(m * c_n + (1.0 - m) * cs[k])
        return tuple(new_h), tuple(new_c)

    zeros = tuple(jnp.zeros((Bp, H), jnp.float32) for _ in range(KS))
    hs, _ = jax.lax.fori_loop(0, T, step, (zeros, zeros), unroll=True)
    for k in range(KS):
        hn_ref[k] = hs[k]


@jax.jit
def bilstm_packed_hn(x_streams, m_streams, w_ih, w_hh, b_g):
    """x_streams: (T, 4, Bp, E), m_streams: (T, 4, Bp, 1),
    w_ih: (4, E, 4H), w_hh: (4, H, 4H), b_g: (4, 1, 4H)  ->  (4, Bp, H)."""
    KS = w_hh.shape[0]
    H = w_hh.shape[1]
    Bp = x_streams.shape[2]
    return pl.pallas_call(
        _bilstm_hn_kernel,
        out_shape=jax.ShapeDtypeStruct((KS, Bp, H), jnp.float32),
    )(x_streams, m_streams, w_ih, w_hh, b_g)


# ---------------------------------------------------------------------------
# Deterministic parameter construction (PyTorch-style fresh init, eval mode).
# ---------------------------------------------------------------------------
class ParamGen:
    def __init__(self, seed=0):
        self.key = jax.random.PRNGKey(seed)
        self.count = 0

    def _next(self):
        self.count += 1
        return jax.random.fold_in(self.key, self.count)

    def uniform(self, shape, bound):
        return jax.random.uniform(self._next(), shape, jnp.float32, -bound, bound)

    def normal(self, shape, std=1.0):
        return jax.random.normal(self._next(), shape, jnp.float32) * std

    def embedding_xavier(self, num, dim):
        bound = math.sqrt(6.0 / (num + dim))
        return self.uniform((num, dim), bound)

    def linear(self, cin, cout):
        bound = 1.0 / math.sqrt(cin)
        return self.uniform((cin, cout), bound), self.uniform((cout,), bound)

    def lstm_direction(self, input_size, hidden):
        bound = 1.0 / math.sqrt(hidden)
        w_ih = self.uniform((input_size, 4 * hidden), bound)   # pre-transposed: x @ w_ih
        w_hh = self.uniform((hidden, 4 * hidden), bound)       # pre-transposed: h @ w_hh
        bias = self.uniform((4 * hidden,), bound) + self.uniform((4 * hidden,), bound)
        return w_ih, w_hh, bias


def bn_eval(num_features, eps=BN_EPS):
    # fresh BatchNorm (gamma=1, beta=0, running_mean=0, running_var=1), eval mode
    scale = jnp.full((num_features,), 1.0 / math.sqrt(1.0 + eps), jnp.float32)
    shift = jnp.zeros((num_features,), jnp.float32)
    return scale, shift


def build_params(field_dims, embed_dim, sequence_length, mlp_dims, seed=0):
    g = ParamGen(seed)
    num_fields = len(field_dims)
    vocab = sum(field_dims)
    E = embed_dim

    offs = [0]
    for d in field_dims[:-1]:
        offs.append(offs[-1] + d)
    offsets = jnp.array(offs, jnp.int32)

    def make_stream(with_domain_attention):
        fc_w, fc_b = g.linear(num_fields * E, E)
        bn_s, bn_b = bn_eval(sequence_length)
        d = {
            "emb": g.embedding_xavier(vocab, E),
            "fc_w": fc_w, "fc_b": fc_b,
            "bn_scale": bn_s, "bn_shift": bn_b,
            "lstm": {"fwd": g.lstm_direction(E, E), "bwd": g.lstm_direction(E, E)},
        }
        if with_domain_attention:
            d["K"] = g.linear(2 * E, 2 * E)
            d["Q"] = g.linear(2 * E, 2 * E)
            d["V"] = g.linear(2 * E, 2 * E)
        return d

    mlp_hidden = []
    in_dim = 2 * E
    for h in mlp_dims:
        w, b = g.linear(in_dim, h)
        s, sh = bn_eval(h)
        mlp_hidden.append((w, b, s, sh))
        in_dim = h
    mlp_out = g.linear(in_dim, 1)

    return {
        "offsets": offsets,
        "shared": make_stream(False),
        "src": make_stream(True),
        "tgt": make_stream(True),
        "linear": {"table": g.normal((vocab, 1), 1.0),
                   "bias": jnp.zeros((1,), jnp.float32)},
        "mlp": {"hidden": tuple(mlp_hidden), "out": mlp_out},
    }


# ---------------------------------------------------------------------------
# Model forward (eval mode; dropout = identity, BN uses running statistics)
# ---------------------------------------------------------------------------
@functools.partial(jax.jit, static_argnames=("dlabel",))
def seq_m3r_forward(params, ids, values, seq_lengths, seq_mask, dlabel="src"):
    del seq_mask  # not used by the reference forward
    B, S, F = ids.shape
    shared = params["shared"]
    dom = params["src"] if dlabel == "src" else params["tgt"]
    E = shared["emb"].shape[1]
    H = E
    T = S - 1
    offsets = params["offsets"]

    # ---- FeaturesEmbedding (gather + value scaling) ----
    def embed(table):
        idx = ids + offsets[None, None, :]                    # (B, S, F)
        emb = jnp.take(table, idx, axis=0)                    # (B, S, F, E)
        return (values[..., None] * emb).reshape(B * S, F * E)

    shared_emb = embed(shared["emb"])
    dom_emb = embed(dom["emb"])

    # ---- fc + BatchNorm1d(seq) + ReLU, both streams in one Pallas launch ----
    M = B * S
    a2 = jnp.stack([shared_emb, dom_emb]).astype(jnp.bfloat16)           # (2, M, F*E)
    w2 = jnp.stack([shared["fc_w"], dom["fc_w"]]).astype(jnp.bfloat16)   # (2, F*E, E)
    b2 = jnp.stack([shared["fc_b"], dom["fc_b"]]).reshape(2, 1, E)
    rs = jnp.stack([jnp.tile(shared["bn_scale"], B),
                    jnp.tile(dom["bn_scale"], B)]).reshape(2, M, 1)      # per-row (= per seq pos)
    rh = jnp.stack([jnp.tile(shared["bn_shift"], B),
                    jnp.tile(dom["bn_shift"], B)]).reshape(2, M, 1)
    t2 = fused_linear_bn_relu(a2, w2, b2, rs, rh)                        # (2, M, E) f32
    shared_t = t2[0].reshape(B, S, E)
    dom_t = t2[1].reshape(B, S, E)

    shared_hist, shared_last = shared_t[:, :-1, :], shared_t[:, -1, :]
    dom_hist, dom_last = dom_t[:, :-1, :], dom_t[:, -1, :]

    # ---- packed bidirectional LSTMs (shared + domain), one Pallas launch ----
    Bp = -(-B // 8) * 8
    lens = seq_lengths.astype(jnp.int32)
    t_idx = jnp.arange(T, dtype=jnp.int32)
    m_fwd = (t_idx[:, None] < lens[None, :]).astype(jnp.float32)          # (T, B)
    m_bwd = (t_idx[:, None] >= (T - lens)[None, :]).astype(jnp.float32)   # (T, B)

    x_sh = jnp.transpose(shared_hist, (1, 0, 2))                          # (T, B, E)
    x_dm = jnp.transpose(dom_hist, (1, 0, 2))
    x_streams = jnp.stack([x_sh, x_sh[::-1], x_dm, x_dm[::-1]], axis=1)   # (T, 4, B, E)
    m_streams = jnp.stack([m_fwd, m_bwd, m_fwd, m_bwd], axis=1)[..., None]
    x_streams = jnp.pad(x_streams, ((0, 0), (0, 0), (0, Bp - B), (0, 0)))
    m_streams = jnp.pad(m_streams, ((0, 0), (0, 0), (0, Bp - B), (0, 0)))

    order = [shared["lstm"]["fwd"], shared["lstm"]["bwd"],
             dom["lstm"]["fwd"], dom["lstm"]["bwd"]]
    w_ih = jnp.stack([p[0] for p in order])                  # (4, E, 4H)
    w_hh = jnp.stack([p[1] for p in order])                  # (4, H, 4H)
    b_g = jnp.stack([p[2] for p in order]).reshape(4, 1, 4 * H)

    hn = bilstm_packed_hn(x_streams, m_streams, w_ih, w_hh, b_g)[:, :B, :]
    shared_hn = 0.5 * (hn[0] + hn[1])     # torch.mean(h_n, dim=0) over the 2 directions
    dom_hn = 0.5 * (hn[2] + hn[3])

    shared_term = jnp.concatenate([shared_hn, shared_last], axis=1)       # (B, 2E)
    dom_term = jnp.concatenate([dom_hn, dom_last], axis=1)                # (B, 2E)

    # ---- domain attention mixture (32x32 linears: too small for a kernel) ----
    def lin(x, wb):
        w, b = wb
        return x @ w + b

    d_k, d_q, d_v = lin(dom_term, dom["K"]), lin(dom_term, dom["Q"]), lin(dom_term, dom["V"])
    s_k, s_q, s_v = lin(shared_term, dom["K"]), lin(shared_term, dom["Q"]), lin(shared_term, dom["V"])
    d_a = jnp.exp(jnp.sum(d_k * d_q, axis=1, keepdims=True) / 7.0)
    s_a = jnp.exp(jnp.sum(s_k * s_q, axis=1, keepdims=True) / 7.0)
    denom = d_a + s_a
    term = (d_a / denom) * d_v + (s_a / denom) * s_v                      # (B, 2E)

    # ---- FeaturesLinear on the last event + MLP head (eval mode) ----
    last_idx = ids[:, -1, :] + offsets[None, :]                           # (B, F)
    lin_out = (jnp.sum(jnp.take(params["linear"]["table"], last_idx, axis=0), axis=1)
               + params["linear"]["bias"])                                # (B, 1)

    x = term
    for (w, b, bns, bnb) in params["mlp"]["hidden"]:
        x = jnp.maximum((x @ w + b) * bns + bnb, 0.0)  # Linear + BN(eval) + ReLU (+Dropout=id)
    w, b = params["mlp"]["out"]
    result = lin_out + (x @ w + b)                                        # (B, 1)
    return jax.nn.sigmoid(result[:, 0]), term


# ---------------------------------------------------------------------------
if __name__ == "__main__":
    # fc has in_features = 56*embed_dim and the domain attention is Linear(32,32),
    # so the module implies fields=56 and embed_dim=16 (2*embed_dim = 32).
    B, S, F, E = 2, 8, 56, 16
    field_dims = [8] * F
    mlp_dims = (64, 32)
    # TODO(synk): training-mode dropout / batch-stat BN not modeled; eval-mode forward only.

    params = build_params(field_dims, E, S, mlp_dims, seed=0)

    key = jax.random.PRNGKey(0)
    k1, k2 = jax.random.split(key)
    ids = jax.random.randint(k1, (B, S, F), 0, field_dims[0], dtype=jnp.int32)
    values = jax.random.uniform(k2, (B, S, F), jnp.float32)
    seq_lengths = jnp.array([S - 1, 3], jnp.int32)   # history lengths, 1 <= len <= S-1
    seq_mask = (jnp.arange(S)[None, :] < (seq_lengths + 1)[:, None]).astype(jnp.float32)

    pred, term = seq_m3r_forward(params, ids, values, seq_lengths, seq_mask, dlabel="src")
    pred = jax.block_until_ready(pred)
    term = jax.block_until_ready(term)

    assert pred.shape == (B,), pred.shape
    assert term.shape == (B, 2 * E), term.shape
    assert bool(jnp.all(jnp.isfinite(pred))) and bool(jnp.all(jnp.isfinite(term)))
    print("KERNEL_OK")
</pallas_src>

<mosaic_0001>
module attributes {stable_mosaic.version = 11 : i64} {
  func.func @_fused_linear_bn_relu_kernel(%arg0: i32, %arg1: memref<1x16x896xbf16, #tpu.memory_space<vmem>>, %arg2: memref<1x896x16xbf16, #tpu.memory_space<vmem>>, %arg3: memref<1x1x16xf32, #tpu.memory_space<vmem>>, %arg4: memref<1x16x1xf32, #tpu.memory_space<vmem>>, %arg5: memref<1x16x1xf32, #tpu.memory_space<vmem>>, %arg6: memref<1x16x16xf32, #tpu.memory_space<vmem>>) attributes {dimension_semantics = [#tpu.dimension_semantics<parallel>], iteration_bounds = array<i64: 2>, scalar_prefetch = 0 : i64, scratch_operands = 0 : i64, tpu.core_type = #tpu.core_type<tc>, window_params = [{transform_indices = @transform_0, window_bounds = array<i64: 1, 16, 896>}, {transform_indices = @transform_1, window_bounds = array<i64: 1, 896, 16>}, {transform_indices = @transform_2, window_bounds = array<i64: 1, 1, 16>}, {transform_indices = @transform_3, window_bounds = array<i64: 1, 16, 1>}, {transform_indices = @transform_4, window_bounds = array<i64: 1, 16, 1>}, {transform_indices = @transform_5, window_bounds = array<i64: 1, 16, 16>}]} {
    %c0 = arith.constant 0 : index
    %c0_0 = arith.constant 0 : index
    %c0_1 = arith.constant 0 : index
    %0 = vector.load %arg1[%c0, %c0_0, %c0_1] : memref<1x16x896xbf16, #tpu.memory_space<vmem>>, vector<1x16x896xbf16>
    %1 = vector.shape_cast %0 : vector<1x16x896xbf16> to vector<16x896xbf16>
    %c0_2 = arith.constant 0 : index
    %c0_3 = arith.constant 0 : index
    %c0_4 = arith.constant 0 : index
    %2 = vector.load %arg2[%c0_2, %c0_3, %c0_4] : memref<1x896x16xbf16, #tpu.memory_space<vmem>>, vector<1x896x16xbf16>
    %3 = vector.shape_cast %2 : vector<1x896x16xbf16> to vector<896x16xbf16>
    %cst = arith.constant dense<0.000000e+00> : vector<16x16xf32>
    %4 = tpu.matmul %1, %3, %cst {dimension_numbers = #tpu.dot_dimension_numbers<[1], [0], [0], [1], [0, 0, 1, 1], [], []>} : vector<16x896xbf16>, vector<896x16xbf16>, vector<16x16xf32> -> vector<16x16xf32>
    %c0_5 = arith.constant 0 : index
    %c0_6 = arith.constant 0 : index
    %c0_7 = arith.constant 0 : index
    %5 = vector.load %arg3[%c0_5, %c0_6, %c0_7] : memref<1x1x16xf32, #tpu.memory_space<vmem>>, vector<1x1x16xf32>
    %6 = vector.shape_cast %5 : vector<1x1x16xf32> to vector<1x16xf32>
    %7 = vector.broadcast %6 : vector<1x16xf32> to vector<16x16xf32>
    %8 = arith.addf %4, %7 : vector<16x16xf32>
    %c0_8 = arith.constant 0 : index
    %c0_9 = arith.constant 0 : index
    %c0_10 = arith.constant 0 : index
    %9 = vector.load %arg4[%c0_8, %c0_9, %c0_10] : memref<1x16x1xf32, #tpu.memory_space<vmem>>, vector<1x16x1xf32>
    %10 = vector.shape_cast %9 : vector<1x16x1xf32> to vector<16x1xf32>
    %11 = vector.broadcast %10 : vector<16x1xf32> to vector<16x16xf32>
    %12 = arith.mulf %8, %11 : vector<16x16xf32>
    %c0_11 = arith.constant 0 : index
    %c0_12 = arith.constant 0 : index
    %c0_13 = arith.constant 0 : index
    %13 = vector.load %arg5[%c0_11, %c0_12, %c0_13] : memref<1x16x1xf32, #tpu.memory_space<vmem>>, vector<1x16x1xf32>
    %14 = vector.shape_cast %13 : vector<1x16x1xf32> to vector<16x1xf32>
    %15 = vector.broadcast %14 : vector<16x1xf32> to vector<16x16xf32>
    %16 = arith.addf %12, %15 : vector<16x16xf32>
    %cst_14 = arith.constant 0.000000e+00 : f32
    %17 = vector.broadcast %cst_14 : f32 to vector<16x16xf32>
    %18 = arith.maximumf %16, %17 : vector<16x16xf32>
    %c0_15 = arith.constant 0 : index
    %c0_16 = arith.constant 0 : index
    %c0_17 = arith.constant 0 : index
    %19 = vector.load %arg6[%c0_15, %c0_16, %c0_17] : memref<1x16x16xf32, #tpu.memory_space<vmem>>, vector<1x16x16xf32>
    %20 = vector.shape_cast %19 : vector<1x16x16xf32> to vector<16x16xf32>
    %21 = vector.shape_cast %18 : vector<16x16xf32> to vector<1x16x16xf32>
    tpu.vector_store %arg6[%c0_15, %c0_16, %c0_17], %21 {strides = array<i32>} : memref<1x16x16xf32, #tpu.memory_space<vmem>>, vector<1x16x16xf32>,
    return
  }
  func.func @transform_0(%arg0: i32) -> (i32, i32, i32) {
    %c0_i32 = arith.constant 0 : i32
    %c0_i32_0 = arith.constant 0 : i32
    %c0_i32_1 = arith.constant 0 : i32
    return %arg0, %c0_i32, %c0_i32_0 : i32, i32, i32
  }
  func.func @transform_1(%arg0: i32) -> (i32, i32, i32) {
    %c0_i32 = arith.constant 0 : i32
    %c0_i32_0 = arith.constant 0 : i32
    %c0_i32_1 = arith.constant 0 : i32
    return %arg0, %c0_i32, %c0_i32_0 : i32, i32, i32
  }
  func.func @transform_2(%arg0: i32) -> (i32, i32, i32) {
    %c0_i32 = arith.constant 0 : i32
    %c0_i32_0 = arith.constant 0 : i32
    %c0_i32_1 = arith.constant 0 : i32
    return %arg0, %c0_i32, %c0_i32_0 : i32, i32, i32
  }
  func.func @transform_3(%arg0: i32) -> (i32, i32, i32) {
    %c0_i32 = arith.constant 0 : i32
    %c0_i32_0 = arith.constant 0 : i32
    %c0_i32_1 = arith.constant 0 : i32
    return %arg0, %c0_i32, %c0_i32_0 : i32, i32, i32
  }
  func.func @transform_4(%arg0: i32) -> (i32, i32, i32) {
    %c0_i32 = arith.constant 0 : i32
    %c0_i32_0 = arith.constant 0 : i32
    %c0_i32_1 = arith.constant 0 : i32
    return %arg0, %c0_i32, %c0_i32_0 : i32, i32, i32
  }
  func.func @transform_5(%arg0: i32) -> (i32, i32, i32) {
    %c0_i32 = arith.constant 0 : i32
    %c0_i32_0 = arith.constant 0 : i32
    %c0_i32_1 = arith.constant 0 : i32
    return %arg0, %c0_i32, %c0_i32_0 : i32, i32, i32
  }
}

</mosaic_0001>

<bundles_post_ra>
// kernel: fused_linear_bn_relu.1
= control target key start
LH: loop header
LB: loop body
LE: loop exit
PB: predicated region body
PF: predicated region fallthrough
CT: control target
= control target key end

     0   :  { %10 = vsyncpa [#allocation3], 0  ;;  %s1703_s0 = inlined_call_operand.vmem [shape: bf16[2,16,896], index: 0, kind: input, shape index: {}]   ;;  %s1704_s1 = inlined_call_operand.vmem [shape: bf16[2,896,16], index: 1, kind: input, shape index: {}]   ;;  %s1705_s2 = inlined_call_operand.vmem [shape: f32[2,1,16], index: 2, kind: input, shape index: {}]   ;;  %s1706_s3 = inlined_call_operand.vmem [shape: f32[2,16,1], index: 3, kind: input, shape index: {}]   ;;  %s1707_s4 = inlined_call_operand.vmem [shape: f32[2,16,1], index: 4, kind: input, shape index: {}]   ;;  %s1708_s5 = inlined_call_operand.hbm [shape: f32[2,16,16], index: 5, kind: output, shape index: {}]  }
   0x1   :  { %12 = vsyncpa [#allocation3 + $0x1], 0  ;;  %s1507_s18 = smov 0   ;;  %s1509_s19 = smov 0  }
   0x2   :  { %s1511_s20 = smov 0   ;;  %s1513_s21 = smov 0  }
   0x3 LB: > { %s1528_s22 = sadd.s32 4294967295, %s1469_s21   ;;  %s1115_s23 = sadd.s32 4294967294, %s1469_s21   ;;  %s1469_s21 = sphi %s1513_s21, %s1714_s21   ;;  %s1465_s20 = sphi %s1511_s20, %s1713_s20   ;;  %s1461_s19 = sphi %s1509_s19, %s1712_s19   ;;  %s1457_s18 = sphi %s1507_s18, %s1711_s18  }
   0x4   : > { %s1532_s24 = sadd.s32 1, %s1469_s21   ;;  %s155_s25 = sadd.s32 1, %s1465_s20 }
   0x5   : > { %s152_s26 = ssub.s32 %s1469_s21, %s1532_s24  ;;  %p165_p0 = scmp.ne.s32.totalorder %s1465_s20, %s1461_s19 }
   0x6   : > { %p153_p1 = scmp.eq.s32.totalorder %s152_s26, 0  ;;  %p166_p2 = scmp.eq.s32.totalorder %s1528_s22, 1 }
   0x7   : > { %p171_p3 = scmp.ne.s32.totalorder %s1461_s19, %s1457_s18  ;;  %p172_p4 = scmp.eq.s32.totalorder %s1115_s23, 1 }
   0x8   : > { %s1543_s27 = scalar_select %p153_p1, %s1465_s20, %s155_s25  }
   0x9   : > { %p1545_p5 = por %p166_p2, %p165_p0  ;;  %p1549_p6 = por %p172_p4, %p171_p3 }
   0xa   : > { %p1118_p7 = scmp.ge.s32.totalorder %s1469_s21, 1  ;;  %p228_p8 = scmp.lt.s32.totalorder %s1469_s21, 3 }
   0xc   : > { %p229_p9 = pnand %p1118_p7, %p228_p8 }
   0xd   : > { %p274_p10 = scmp.lt.s32.totalorder (!%p229_p9), %s1528_s22, 1  ;;  %v1471_v0 = vmov (!%p229_p9), 0   ;;  %v1472_v41 = vmov (!%p229_p9), 0.0   ;;  %vm1473_vm0 = vmmov (!%p229_p9), 0   ;;  %s1197_s12 = sshll.u32 (!%p229_p9), %s1528_s22, 8  ;;  %vm991_vm1 = vcmask (!%p229_p9), 130048  }
   0xe   : > { %232 = sbr.rel (%p229_p9) target bundleno = 333 (0x14d), region = 40  ;;  %1339 = vset.pattern.permute.xlu0 (!%p229_p9), %v1471_v0  ;;  %1340 = vset.pattern.permute.xlu1 (!%p229_p9), %v1471_v0  ;;  %s1658_s15 = scalar_lea.hbm (!%p229_p9), %s1708_s5, %s1197_s12 }
  0x15   : > { %s1557_s30 = scalar_select %p274_p10, %s1528_s22, 1 }
  0x17   : > { %s1294_s6 = smul.u32 448, %s1557_s30  ;;  %s1195_s7 = sshll.u32 %s1557_s30, 4 }
  0x18   : > { %s291_s10 = scalar_lea.vmem %s1706_s3, %s1195_s7  ;;  %s1293_s14 = smul.u32 56, %s1557_s30 }
  0x19   : > { %s1569_s13 = scalar_lea.vmem %s1704_s1, %s1294_s6  ;;  %v961_v1 = vld [vmem:[%s291_s10] sm:$0xff]  ;;  %v962_v2 = vld [vmem:[%s291_s10 + $0x8] sm:$0xff]  ;;  %s296_s26 = scalar_lea.vmem %s1707_s4, %s1195_s7 }
  0x1a   : > { %v1341_v3 = vld [vmem:[%s1569_s13 + $0x40] sm:$0xff]   ;;  %965 = vperm.xlu0 %1339, %v961_v1   ;;  %v1345_v7 = vld [vmem:[%s1569_s13 + $0x48] sm:$0xff]   ;;  %v1349_v11 = vld [vmem:[%s1569_s13 + $0x50] sm:$0xff]   ;;  %s1604_s17 = scalar_lea.vmem %s1703_s0, %s1293_s14  ;;  %s286_s8 = scalar_lea.vmem %s1705_s2, %s1557_s30 }
  0x1b   : > { %v1342_v4 = vld [vmem:[%s1569_s13] sm:$0xff]   ;;  %1198 = vmatprep.subr.bf16.mxu0 %v1341_v3  ;;  %v1346_v8 = vld [vmem:[%s1569_s13 + $0x8] sm:$0xff]   ;;  %v1350_v12 = vld [vmem:[%s1569_s13 + $0x10] sm:$0xff]   ;;  %s271_s30 = sand.u32 1, %s1461_s19  }
  0x1c   : > { %v1343_v5 = vld [vmem:[%s1569_s13 + $0xc0] sm:$0xff]   ;;  %1199 = vmatpush3.bf16.msra.mxu0 %v1342_v4  ;;  %v1347_v9 = vld [vmem:[%s1569_s13 + $0xc8] sm:$0xff]   ;;  %v1351_v13 = vld [vmem:[%s1569_s13 + $0xd0] sm:$0xff]   ;;  %s1119_s9 = sshll.u32 %s271_s30, 4  ;;  %s1662_s16 = scalar_lea.sflag [#allocation3], %s271_s30 }
  0x1d   : > { %v1344_v6 = vld [vmem:[%s1569_s13 + $0x80] sm:$0xff]   ;;  %1220 = vmatprep.subr.bf16.mxu1 %v1343_v5  ;;  %1200 = vmatprep.subr.bf16.mxu0 %v1345_v7  ;;  %v1348_v10 = vld [vmem:[%s1569_s13 + $0x88] sm:$0xff]   ;;  %v1352_v14 = vld [vmem:[%s1569_s13 + $0x90] sm:$0xff]   ;;  %s273_s10 = scalar_lea.vmem [#allocation2], %s1119_s9 }
  0x1e   : > { %970 = vperm.xlu0 %1339, %v962_v2   ;;  %1221 = vmatpush3.bf16.msra.mxu1 %v1344_v6  ;;  %v1353_v15 = vld [vmem:[%s1569_s13 + $0x58] sm:$0xff]   ;;  %v1357_v19 = vld [vmem:[%s1569_s13 + $0x60] sm:$0xff]   ;;  %v1361_v23 = vld [vmem:[%s1569_s13 + $0x68] sm:$0xff]   ;;  %s1008_s11 = sshll.u32 %s273_s10, 4  ;;  %s1653_s11 = int_to_ptr.vmem [resolvable:$true] %s1008_s11 }
  0x1f   : > { %1222 = vmatprep.subr.bf16.mxu1 %v1347_v9  ;;  %v1354_v16 = vld [vmem:[%s1569_s13 + $0x18] sm:$0xff]   ;;  %v1358_v20 = vld [vmem:[%s1569_s13 + $0x20] sm:$0xff]   ;;  %v1362_v24 = vld [vmem:[%s1569_s13 + $0x28] sm:$0xff]   ;;  %s1407_s22 = scalar_lea.vmem %s1653_s11, 256 }
  0x20   : > { %1201 = vmatpush3.bf16.msra.mxu0 %v1346_v8  ;;  %v1355_v17 = vld [vmem:[%s1569_s13 + $0xd8] sm:$0xff]   ;;  %v1359_v21 = vld [vmem:[%s1569_s13 + $0xe0] sm:$0xff]   ;;  %v1363_v25 = vld [vmem:[%s1569_s13 + $0xe8] sm:$0xff]   ;;  %p1408_p11 = scmp.ne.s32.totalorder %s1653_s11, %s1407_s22 }
  0x21   : > { %1202 = vmatprep.subr.bf16.mxu0 %v1349_v11  ;;  %v1356_v18 = vld [vmem:[%s1569_s13 + $0x98] sm:$0xff]   ;;  %v1360_v22 = vld [vmem:[%s1569_s13 + $0xa0] sm:$0xff]   ;;  %v1364_v26 = vld [vmem:[%s1569_s13 + $0xa8] sm:$0xff]  }
  0x22   : > { %1223 = vmatpush3.bf16.msra.mxu1 %v1348_v10  ;;  %v1365_v27 = vld [vmem:[%s1569_s13 + $0x70] sm:$0xff]   ;;  %v1369_v31 = vld [vmem:[%s1569_s13 + $0x78] sm:$0xff]   ;;  %v1374_v35 = vld [vmem:[%s1604_s17 + $0x4] ss:$28 sps:$4 sm:$0xff]   ;;  %p1409_p12 = pnand %p1408_p11, %p1545_p5 }
  0x23   : > { %1224 = vmatprep.subr.bf16.mxu1 %v1351_v13  ;;  %v1366_v28 = vld [vmem:[%s1569_s13 + $0x30] sm:$0xff]   ;;  %v1370_v32 = vld [vmem:[%s1569_s13 + $0x38] sm:$0xff]   ;;  %829 = vmatprep.mubr.bf16.mxu0 %v1374_v35  ;;  %v1376_v37 = vld [vmem:[%s1569_s13 + $0x140] sm:$0xff]  }
  0x24   : > { %1203 = vmatpush3.bf16.msra.mxu0 %v1350_v12  ;;  %v1367_v29 = vld [vmem:[%s1569_s13 + $0xf0] sm:$0xff]   ;;  %v1371_v33 = vld [vmem:[%s1569_s13 + $0xf8] sm:$0xff]   ;;  %v1377_v38 = vld [vmem:[%s1604_s17 + $0x8] ss:$28 sps:$4 sm:$0xff]   ;;  %p1410_p13 = pneg %p1409_p12 }
  0x25   : > { %1204 = vmatprep.subr.bf16.mxu0 %v1353_v15  ;;  %v1368_v30 = vld [vmem:[%s1569_s13 + $0xb0] sm:$0xff]   ;;  %v1372_v34 = vld [vmem:[%s1604_s17] ss:$28 sps:$4 sm:$0xff]   ;;  %v1379_v39 = vld [vmem:[%s1604_s17 + $0xc] ss:$28 sps:$4 sm:$0xff]  }
  0x26   : > { %1225 = vmatpush3.bf16.msra.mxu1 %v1352_v14  ;;  %v1375_v36 = vld [vmem:[%s1569_s13 + $0xb8] sm:$0xff]   ;;  %v1380_v40 = vld [vmem:[%s1569_s13 + $0x100] sm:$0xff]   ;;  %870 = vmatprep.mubr.bf16.mxu1 %v1379_v39  ;;  %v1382_v43 = vld [vmem:[%s1569_s13 + $0x148] sm:$0xff]  }
  0x27   : > { %1226 = vmatprep.subr.bf16.mxu1 %v1355_v17  ;;  %v1381_v42 = vld [vmem:[%s1569_s13 + $0x180] sm:$0xff]   ;;  %v1383_v44 = vld [vmem:[%s1569_s13 + $0x108] sm:$0xff]   ;;  %v1385_v46 = vld [vmem:[%s1569_s13 + $0x150] sm:$0xff]  }
  0x28   : > { %1205 = vmatpush3.bf16.msra.mxu0 %v1354_v16  ;;  %v1384_v45 = vld [vmem:[%s1569_s13 + $0x188] sm:$0xff]   ;;  %v1386_v47 = vld [vmem:[%s1569_s13 + $0x110] sm:$0xff]   ;;  %v1388_v49 = vld [vmem:[%s1569_s13 + $0x158] sm:$0xff]  }
  0x29   : > { %1206 = vmatprep.subr.bf16.mxu0 %v1357_v19  ;;  %v1387_v48 = vld [vmem:[%s1569_s13 + $0x190] sm:$0xff]   ;;  %v1389_v50 = vld [vmem:[%s1569_s13 + $0x118] sm:$0xff]   ;;  %v1391_v52 = vld [vmem:[%s1569_s13 + $0x160] sm:$0xff]  }
  0x2a   : > { %1227 = vmatpush3.bf16.msra.mxu1 %v1356_v18  ;;  %v1390_v51 = vld [vmem:[%s1569_s13 + $0x198] sm:$0xff]   ;;  %v1392_v53 = vld [vmem:[%s1569_s13 + $0x120] sm:$0xff]   ;;  %v1394_v55 = vld [vmem:[%s1569_s13 + $0x168] sm:$0xff]  }
  0x2b   : > { %1228 = vmatprep.subr.bf16.mxu1 %v1359_v21  ;;  %v1393_v54 = vld [vmem:[%s1569_s13 + $0x1a0] sm:$0xff]   ;;  %v1395_v56 = vld [vmem:[%s1569_s13 + $0x128] sm:$0xff]   ;;  %v1397_v58 = vld [vmem:[%s1569_s13 + $0x170] sm:$0xff]  }
  0x2c   : > { %1207 = vmatpush3.bf16.msra.mxu0 %v1358_v20  ;;  %v1396_v57 = vld [vmem:[%s1569_s13 + $0x1a8] sm:$0xff]   ;;  %v1398_v59 = vld [vmem:[%s1569_s13 + $0x130] sm:$0xff]   ;;  %v1400_v62 = vld [vmem:[%s1569_s13 + $0x178] sm:$0xff]  }
  0x2d   : > { %1208 = vmatprep.subr.bf16.mxu0 %v1361_v23  ;;  %v1399_v60 = vld [vmem:[%s1569_s13 + $0x1b0] sm:$0xff]   ;;  %v975_v63 = vld [vmem:[%s296_s26] sm:$0xff]  ;;  %v1401_v0 = vld [vmem:[%s1569_s13 + $0x138] sm:$0xff]  }
  0x2e   : > { %1229 = vmatpush3.bf16.msra.mxu1 %v1360_v22  ;;  %v1404_v61 = vld [vmem:[%s1604_s17 + $0x14] ss:$28 sps:$4 sm:$0xff]   ;;  %979 = vperm.xlu1 %1340, %v975_v63   ;;  %v1405_v1 = vld [vmem:[%s1569_s13 + $0x1b8] sm:$0xff]   ;;  %v976_v2 = vld [vmem:[%s296_s26 + $0x8] sm:$0xff] }
  0x2f   : > { %1230 = vmatprep.subr.bf16.mxu1 %v1363_v25  ;;  %v1402_v3 = vld [vmem:[%s1604_s17 + $0x10] ss:$28 sps:$4 sm:$0xff]   ;;  %v1406_v4 = vld [vmem:[%s1604_s17 + $0x18] ss:$28 sps:$4 sm:$0xff]   ;;  %v1126_v6 = vld [vmem:[%s286_s8] ss:$0 sm:$0xff] }
  0x30   : > { %1209 = vmatpush3.bf16.msra.mxu0 %v1362_v24  ;;  %s1474_s17 = smov [#allocation2]  }
  0x31   : > { %1210 = vmatprep.subr.bf16.mxu0 %v1365_v27  ;;  %s1411_s23 = sshll.u32 %s1474_s17, 4  ;;  %s1412_s23 = int_to_ptr.vmem [resolvable:$false] %s1411_s23 }
  0x32   : > { %1231 = vmatpush3.bf16.msra.mxu1 %v1364_v26  ;;  %984 = vperm.xlu1 %1340, %v976_v2   ;;  %s1413_s25 = scalar_lea.vmem %s1412_s23, 512  ;;  %p1414_p0 = scmp.lt.s32.totalorder %s1653_s11, %s1412_s23 }
  0x33   : > { %1232 = vmatprep.subr.bf16.mxu1 %v1367_v29  ;;  %p1415_p1 = scmp.lt.s32.totalorder %s1413_s25, %s1407_s22 }
  0x34   : > { %1211 = vmatpush3.bf16.msra.mxu0 %v1366_v28 }
  0x35   : > { %1212 = vmatprep.subr.bf16.mxu0 %v1369_v31  ;;  %p1416_p2 = por %p1415_p1, %p1414_p0 }
  0x36   : > { %1233 = vmatpush3.bf16.msra.mxu1 %v1368_v30 }
  0x37   : > { %1234 = vmatprep.subr.bf16.mxu1 %v1371_v33  ;;  %p1417_p3 = pnand %p1416_p2, %p1410_p13 }
  0x38   : > { %1213 = vmatpush3.bf16.msra.mxu0 %v1370_v32 }
  0x39   : > { %1242 = vmatprep.subr.bf16.mxu0 %v1376_v37 }
  0x3a   : > { %1235 = vmatpush3.bf16.msra.mxu1 %v1375_v36 }
  0x3b   : > { %830 = vmatmul.mubr.bf16.vlgmr.msra.gmra.mrb[0].mxu0 %v1372_v34  ;;  %1273 = vmatprep.subr.bf16.mxu1 %v1472_v41 }
  0x3c   : > { %1243 = vmatpush3.bf16.msra.mxu0 %v1380_v40  ;;  %911 = vmatprep.mubr.bf16.mxu0 %v1404_v61 }
  0x3d   : > { %871 = vmatmul.mubr.bf16.vlgmr.msra.gmra.mrb[0].mxu1 %v1377_v38  ;;  %1244 = vmatprep.subr.bf16.mxu0 %v1382_v43 }
  0x3e   : > { %1274 = vmatpush3.bf16.msra.mxu1 %v1381_v42  ;;  %1289 = vmatprep.mubr.msk.bf16.mxu1 %vm1473_vm0, %v1472_v41 }
  0x3f   : > { %1275 = vmatprep.subr.bf16.mxu1 %v1472_v41 }
  0x40   : > { %1245 = vmatpush3.bf16.msra.mxu0 %v1383_v44 }
  0x41   : > { %1246 = vmatprep.subr.bf16.mxu0 %v1385_v46 }
  0x42   : > { %1276 = vmatpush3.bf16.msra.mxu1 %v1384_v45 }
  0x43   : > { %1277 = vmatprep.subr.bf16.mxu1 %v1472_v41 }
  0x44   : > { %1247 = vmatpush3.bf16.msra.mxu0 %v1386_v47 }
  0x45   : > { %1248 = vmatprep.subr.bf16.mxu0 %v1388_v49 }
  0x46   : > { %1278 = vmatpush3.bf16.msra.mxu1 %v1387_v48 }
  0x47   : > { %1279 = vmatprep.subr.bf16.mxu1 %v1472_v41 }
  0x48   : > { %1249 = vmatpush3.bf16.msra.mxu0 %v1389_v50 }
  0x49   : > { %1250 = vmatprep.subr.bf16.mxu0 %v1391_v52 }
  0x4a   : > { %1280 = vmatpush3.bf16.msra.mxu1 %v1390_v51 }
  0x4b   : > { %1281 = vmatprep.subr.bf16.mxu1 %v1472_v41 }
  0x4c   : > { %1251 = vmatpush3.bf16.msra.mxu0 %v1392_v53 }
  0x4d   : > { %1252 = vmatprep.subr.bf16.mxu0 %v1394_v55 }
  0x4e   : > { %1282 = vmatpush3.bf16.msra.mxu1 %v1393_v54 }
  0x4f   : > { %1283 = vmatprep.subr.bf16.mxu1 %v1472_v41 }
  0x50   : > { %1253 = vmatpush3.bf16.msra.mxu0 %v1395_v56 }
  0x51   : > { %1254 = vmatprep.subr.bf16.mxu0 %v1397_v58 }
  0x52   : > { %1284 = vmatpush3.bf16.msra.mxu1 %v1396_v57 }
  0x53   : > { %1285 = vmatprep.subr.bf16.mxu1 %v1472_v41 }
  0x54   : > { %1255 = vmatpush3.bf16.msra.mxu0 %v1398_v59 }
  0x55   : > { %1256 = vmatprep.subr.bf16.mxu0 %v1400_v62 }
  0x56   : > { %1286 = vmatpush3.bf16.msra.mxu1 %v1399_v60 }
  0x57   : > { %1287 = vmatprep.subr.bf16.mxu1 %v1472_v41 }
  0x58   : > { %1257 = vmatpush3.bf16.msra.mxu0 %v1401_v0 }
  0x5a   : > { %1288 = vmatpush3.bf16.msra.mxu1 %v1405_v1 }
  0x5b   : > { %912 = vmatmul.mubr.bf16.vlgmr.msra.gmra.mrb[4].mxu0 %v1402_v3 }
  0x5d   : > { %1290 = vmatmul.mubr.bf16.vlgmr.msra.gmra.mrb[4].mxu1 %v1406_v4 }
  0x99   : > { %v966_v23 = vpop.permute.xlu0 %965 }
  0x9d   : > { %v971_v39 = vpop.permute.xlu0 %970 }
  0xad   : > { %v980_v34 = vpop.permute.xlu1 %979 }
  0xb1   : > { %v985_v42 = vpop.permute.xlu1 %984 }
 0x10e   : > { %v1214_v5 = vpop.f32.mrb[0].mxu0 }
 0x10f   : > { %v1215_v7 = vpop.f32.mrb[1].mxu0 }
 0x110   : > { %v1216_v8 = vadd.f32 %v1215_v7, %v1214_v5  ;;  %v1217_v9 = vpop.f32.mrb[2].mxu0  ;;  %v1236_v10 = vpop.f32.mrb[0].mxu1 }
 0x111   : > { %v1218_v11 = vpop.f32.mrb[3].mxu0  ;;  %v1237_v14 = vpop.f32.mrb[1].mxu1 }
 0x112   : > { %v832_v12 = vadd.f32 %v1216_v8, %v1126_v6  ;;  %v1219_v13 = vadd.f32 %v1218_v11, %v1217_v9  ;;  %v1238_v15 = vadd.f32 %v1237_v14, %v1236_v10  ;;  %v1239_v16 = vpop.f32.mrb[2].mxu1 }
 0x113   : > { %v1240_v18 = vpop.f32.mrb[3].mxu1 }
 0x114   : > { %v835_v17 = vadd.f32 %v1219_v13, %v1126_v6  ;;  %v873_v19 = vadd.f32 %v1238_v15, %v832_v12  ;;  %v1241_v20 = vadd.f32 %v1240_v18, %v1239_v16 }
 0x116   : > { %v876_v21 = vadd.f32 %v1241_v20, %v835_v17 }
 0x12e   : > { %v1258_v22 = vpop.f32.mrb[4].mxu0 }
 0x12f   : > { %v1259_v24 = vpop.f32.mrb[5].mxu0 }
 0x130   : > { %v954_v25 = vpop.f32.mrb[4].mxu1  ;;  %v1260_v26 = vadd.f32 %v1259_v24, %v1258_v22  ;;  %v1261_v27 = vpop.f32.mrb[6].mxu0 }
 0x131   : > { %v1291_v28 = vpop.f32.mrb[5].mxu1  ;;  %v1262_v29 = vpop.f32.mrb[7].mxu0 }
 0x132   : > { %v957_v30 = vpop.f32.mrb[6].mxu1  ;;  %v914_v31 = vadd.f32 %v1260_v26, %v873_v19  ;;  %v1263_v32 = vadd.f32 %v1262_v29, %v1261_v27 }
 0x133   : > { %v1292_v33 = vpop.f32.mrb[7].mxu1 }
 0x134   : > { %v955_v35 = vadd.f32 %v954_v25, %v914_v31  ;;  %v917_v36 = vadd.f32 %v1263_v32, %v876_v21 }
 0x136   : > { %v973_v37 = vmul.f32 %v966_v23, %v955_v35  ;;  %v958_v38 = vadd.f32 %v957_v30, %v917_v36 }
 0x138   : > { %v987_v40 = vadd.f32 %v980_v34, %v973_v37  ;;  %v974_v41 = vmul.f32 %v971_v39, %v958_v38 }
 0x13a   : > { %v989_v43 = vmax.f32 %v987_v40, 0.0  ;;  %v988_v44 = vadd.f32 %v985_v42, %v974_v41 }
 0x13c   : > { %992 = vst.msk [vmem:[%s273_s10] sm:$0xff] %vm991_vm1, %v989_v43  ;;  %v990_v45 = vmax.f32 %v988_v44, 0.0 }
 0x13e   : > { %993 = vst.msk [vmem:[%s273_s10 + $0x8] sm:$0xff] %vm991_vm1, %v990_v45 }
 0x13f   : > { %1420 = shalt.err (!%p1417_p3)
}
 0x140   : > { %s1421_s26 = scalar_lea.hbm %s1658_s15, 256  ;;  %s1425_s8 = scalar_lea.hbm %s1708_s5, 512 }
 0x141   : > { %p1422_p4 = scmp.ne.s32.totalorder %s1658_s15, %s1421_s26  ;;  %p1426_p9 = scmp.lt.u32.totalorder %s1658_s15, %s1708_s5 }
 0x142   : > { %p1427_p10 = scmp.lt.u32.totalorder %s1425_s8, %s1421_s26  ;;  %p1429_p12 = scmp.lt.u32.totalorder %s1421_s26, %s1658_s15 }
 0x143   : > { %p1423_p7 = pnand %p1422_p4, %p1545_p5 }
 0x144   : > { %p1428_p11 = por %p1427_p10, %p1426_p9 }
 0x145   : > { %p1424_p8 = pneg %p1423_p7 }
 0x146   : > { %p1430_p13 = por %p1429_p12, %p1428_p11 }
 0x148   : > { %p1431_p0 = pnand %p1430_p13, %p1424_p8 }
 0x14a   : > { %1434 = shalt.err (!%p1431_p0)
}
 0x14b   : > { %s1475_s10 = smov 128   ;;  %s1476_s12 = smov 8  }
 0x14c   : > { %1295 = dma.vmem_to_hbm [thread:$0]  (%p1545_p5), %s1653_s11, 256, %s1658_s15, %s1662_s16, %s1475_s10, %s1475_s10, %s1476_s12  }
 0x14d PF: > { %p1301_p1 = scmp.ge.s32.totalorder %s1469_s21, 2  ;;  %s1023_s13 = sand.u32 1, %s1457_s18  }
 0x14e   : > { %s1024_s14 = scalar_lea.sflag [#allocation3], %s1023_s13 }
 0x14f   : > { %p1298_p2 = pnand %p1301_p1, %p1549_p6 }
 0x151   : > { %1452 = dma.done.wait (!%p1298_p2), %s1024_s14, 256  }
 0x152   : > { %1454 = vsyncadd (!%p1298_p2), %s1024_s14, 4294967040  ;;  %p15_p3 = scmp.ge.s32.totalorder %s1532_s24, 4   ;;  %s1711_s18 = smov %s1461_s19 }
 0x153   : > { %s1712_s19 = smov %s1465_s20  ;;  %s1713_s20 = smov %s1543_s27 }
 0x154   : > { %s1714_s21 = smov %s1532_s24  ;;  %17 = sbr.rel (!%p15_p3) target bundleno = 3 (0x3), region = 87 }
 0x15b   :  { %1029 = vsyncpa [#allocation3], 1 }
 0x15c   :  { %1031 = vsyncpa [#allocation3 + $0x1], 1 }

</bundles_post_ra>
